<compile_context>
chip_gen: v7x
topology: tpu7x:2x2x1
jax: 0.10.0
libtpu: 0.0.40
codegen_flags: <defaults>
</compile_context>

<pallas_src>
import functools

import jax
import jax.numpy as jnp
from jax import lax
from jax.experimental import pallas as pl
from jax.experimental.pallas import tpu as pltpu


# ---------------------------------------------------------------------------
# helpers
# ---------------------------------------------------------------------------
def _sublane_align(dtype):
    """Sublane alignment for packed dtypes: f32 -> 8, bf16 -> 16, int8/fp8 -> 32."""
    return max(8, 32 // jnp.dtype(dtype).itemsize)


def _pick_tile(dim, target, align):
    """Largest aligned tile <= target; whole axis if it already fits."""
    if dim <= target:
        return dim                      # full-extent block is always legal
    return max((target // align) * align, align)


def _vmem_cap_bytes():
    """Generation-aware VMEM ceiling (v7x: 64 MiB/TC, v5e/v6e: 128 MiB)."""
    try:
        cap = int(pltpu.get_tpu_info().vmem_capacity_bytes)
    except Exception:                   # info unavailable -> be conservative
        cap = 64 * 1024 * 1024
    return (cap * 3) // 4               # headroom for compiler scratch


def _vmem_limit_bytes(per_step_bytes):
    """Double-buffered per-step footprint with 2x headroom, generation-capped."""
    cap = _vmem_cap_bytes()
    return int(min(max(2 * per_step_bytes, 32 * 1024 * 1024), cap))


def _isz(x):
    return jnp.dtype(x.dtype).itemsize


# ---------------------------------------------------------------------------
# forward(): elementwise product head_emb * rel_emb (API parity; mem-bound)
# ---------------------------------------------------------------------------
def _mul_kernel(head_ref, rel_ref, out_ref):
    out_ref[...] = head_ref[...] * rel_ref[...]


def distmult_forward(head_emb, rel_emb, *, tile_b=1024):
    B, D = head_emb.shape
    assert rel_emb.shape == (B, D)
    tb = _pick_tile(B, tile_b, _sublane_align(head_emb.dtype))
    spec = pl.BlockSpec((tb, D), lambda i: (i, 0))
    return pl.pallas_call(
        _mul_kernel,
        out_shape=jax.ShapeDtypeStruct((B, D), head_emb.dtype),
        grid_spec=pltpu.PrefetchScalarGridSpec(
            num_scalar_prefetch=0,
            grid=(pl.cdiv(B, tb),),
            in_specs=[spec, spec],
            out_specs=spec,
        ),
        compiler_params=pltpu.CompilerParams(
            dimension_semantics=("parallel",)),
    )(head_emb, rel_emb)


# ---------------------------------------------------------------------------
# get_logits(): pred @ ent_embed.T + bias   (entity table kept in (N, D))
# ---------------------------------------------------------------------------
def _logits_kernel(pred_ref, ent_ref, bias_ref, out_ref, *, mxu_dtype):
    # pred_ref: (tb, D), ent_ref: (tn, D), bias_ref: (1, tn)
    pred = pred_ref[...]
    ent = ent_ref[...]
    if mxu_dtype is not None:
        pred = pred.astype(mxu_dtype)
        ent = ent.astype(mxu_dtype)
    logits = lax.dot_general(
        pred, ent,
        dimension_numbers=(((1,), (1,)), ((), ())),   # contract D with D
        preferred_element_type=jnp.float32)
    out_ref[...] = (logits + bias_ref[...].astype(jnp.float32)
                    ).astype(out_ref.dtype)


def distmult_get_logits(pred, ent_embed, bias, *,
                        tile_b=512, tile_n=2048,
                        out_dtype=None, mxu_dtype=None):
    B, D = pred.shape
    N, D2 = ent_embed.shape
    assert D == D2 and bias.shape == (N,)
    out_dtype = out_dtype or pred.dtype

    tb = _pick_tile(B, tile_b, _sublane_align(pred.dtype))
    tn = _pick_tile(N, tile_n, 128)     # lane-dense output slabs
    bias2d = bias.reshape(1, N)

    osz = jnp.dtype(out_dtype).itemsize
    per_step = 2 * (tb * D * _isz(pred) + tn * D * _isz(ent_embed)
                    + tn * _isz(bias2d) + tb * tn * osz)

    n_tiles_n = pl.cdiv(N, tn)
    cost = pl.CostEstimate(
        flops=2 * B * N * D,
        transcendentals=0,
        # ent table read once (block index only depends on outer axis);
        # pred is re-streamed once per N tile.
        bytes_accessed=(N * D * _isz(ent_embed)
                        + n_tiles_n * B * D * _isz(pred)
                        + N * _isz(bias2d) + B * N * osz))

    kernel = functools.partial(_logits_kernel, mxu_dtype=mxu_dtype)
    return pl.pallas_call(
        kernel,
        out_shape=jax.ShapeDtypeStruct((B, N), out_dtype),
        grid_spec=pltpu.PrefetchScalarGridSpec(
            num_scalar_prefetch=0,
            # N axis OUTER: entity table streamed once; on v7x the megacore
            # split lands on N so each TC reads half the table.
            grid=(n_tiles_n, pl.cdiv(B, tb)),
            in_specs=[
                pl.BlockSpec((tb, D), lambda i, j: (j, 0)),
                pl.BlockSpec((tn, D), lambda i, j: (i, 0)),
                pl.BlockSpec((1, tn), lambda i, j: (0, i)),
            ],
            out_specs=pl.BlockSpec((tb, tn), lambda i, j: (j, i)),
        ),
        compiler_params=pltpu.CompilerParams(
            dimension_semantics=("parallel", "parallel"),
            vmem_limit_bytes=_vmem_limit_bytes(per_step)),
        cost_estimate=cost,
    )(pred, ent_embed, bias2d)


# ---------------------------------------------------------------------------
# fused hot path: (head_emb * rel_emb) @ ent_embed.T + bias in ONE kernel
# ---------------------------------------------------------------------------
def _fused_logits_kernel(head_ref, rel_ref, ent_ref, bias_ref, out_ref, *,
                         mxu_dtype):
    # The VPU multiply is hidden under the MXU matmul.
    pred = head_ref[...] * rel_ref[...]
    ent = ent_ref[...]
    if mxu_dtype is not None:
        pred = pred.astype(mxu_dtype)
        ent = ent.astype(mxu_dtype)
    logits = lax.dot_general(
        pred, ent,
        dimension_numbers=(((1,), (1,)), ((), ())),   # contract D with D
        preferred_element_type=jnp.float32)
    out_ref[...] = (logits + bias_ref[...].astype(jnp.float32)
                    ).astype(out_ref.dtype)


def distmult_forward_and_logits(head_emb, rel_emb, ent_embed, bias, *,
                                tile_b=512, tile_n=2048,
                                out_dtype=None, mxu_dtype=None):
    B, D = head_emb.shape
    N, D2 = ent_embed.shape
    assert D == D2 and rel_emb.shape == (B, D) and bias.shape == (N,)
    out_dtype = out_dtype or head_emb.dtype

    tb = _pick_tile(B, tile_b, _sublane_align(head_emb.dtype))
    tn = _pick_tile(N, tile_n, 128)
    bias2d = bias.reshape(1, N)

    osz = jnp.dtype(out_dtype).itemsize
    per_step = 2 * (2 * tb * D * _isz(head_emb) + tn * D * _isz(ent_embed)
                    + tn * _isz(bias2d) + tb * tn * osz)

    n_tiles_n = pl.cdiv(N, tn)
    cost = pl.CostEstimate(
        flops=2 * B * N * D + B * D,
        transcendentals=0,
        bytes_accessed=(N * D * _isz(ent_embed)
                        + n_tiles_n * 2 * B * D * _isz(head_emb)
                        + N * _isz(bias2d) + B * N * osz))

    kernel = functools.partial(_fused_logits_kernel, mxu_dtype=mxu_dtype)
    return pl.pallas_call(
        kernel,
        out_shape=jax.ShapeDtypeStruct((B, N), out_dtype),
        grid_spec=pltpu.PrefetchScalarGridSpec(
            num_scalar_prefetch=0,
            grid=(n_tiles_n, pl.cdiv(B, tb)),   # N outer, B inner
            in_specs=[
                pl.BlockSpec((tb, D), lambda i, j: (j, 0)),
                pl.BlockSpec((tb, D), lambda i, j: (j, 0)),
                pl.BlockSpec((tn, D), lambda i, j: (i, 0)),
                pl.BlockSpec((1, tn), lambda i, j: (0, i)),
            ],
            out_specs=pl.BlockSpec((tb, tn), lambda i, j: (j, i)),
        ),
        compiler_params=pltpu.CompilerParams(
            dimension_semantics=("parallel", "parallel"),
            vmem_limit_bytes=_vmem_limit_bytes(per_step)),
        cost_estimate=cost,
    )(head_emb, rel_emb, ent_embed, bias2d)


# ---------------------------------------------------------------------------
# score_fn(): sum(pred.unsqueeze(1) * sample_embed, -1) + bias
# ---------------------------------------------------------------------------
def _score_kernel(pred_ref, sample_ref, bias_ref, out_ref):
    # pred: (tb, D), sample: (tb, S, D), bias: (tb, S)
    prod = pred_ref[...][:, None, :] * sample_ref[...]
    scores = jnp.sum(prod.astype(jnp.float32), axis=-1)
    out_ref[...] = (scores + bias_ref[...].astype(jnp.float32)
                    ).astype(out_ref.dtype)


def distmult_score_fn(pred, sample_embed, bias, *, tile_b=512, out_dtype=None):
    B, D = pred.shape
    B2, S, D2 = sample_embed.shape
    assert B == B2 and D == D2 and bias.shape == (B, S)
    out_dtype = out_dtype or pred.dtype

    tb = _pick_tile(B, tile_b, _sublane_align(pred.dtype))
    per_step = 2 * (tb * D * _isz(pred) + tb * S * D * _isz(sample_embed)
                    + 2 * tb * S * 4)
    cost = pl.CostEstimate(
        flops=2 * B * S * D,
        transcendentals=0,
        bytes_accessed=(B * D * _isz(pred) + B * S * D * _isz(sample_embed)
                        + 2 * B * S * 4))

    return pl.pallas_call(
        _score_kernel,
        out_shape=jax.ShapeDtypeStruct((B, S), out_dtype),
        grid_spec=pltpu.PrefetchScalarGridSpec(
            num_scalar_prefetch=0,
            grid=(pl.cdiv(B, tb),),
            in_specs=[
                pl.BlockSpec((tb, D), lambda i: (i, 0)),
                pl.BlockSpec((tb, S, D), lambda i: (i, 0, 0)),
                pl.BlockSpec((tb, S), lambda i: (i, 0)),
            ],
            out_specs=pl.BlockSpec((tb, S), lambda i: (i, 0)),
        ),
        compiler_params=pltpu.CompilerParams(
            dimension_semantics=("parallel",),
            vmem_limit_bytes=_vmem_limit_bytes(per_step)),
        cost_estimate=cost,
    )(pred, sample_embed, bias)


# ---------------------------------------------------------------------------
if __name__ == "__main__":
    # Small shapes consistent with the module (n_ent entities, emb_dim embed).
    batch, emb_dim, n_ent, n_samp = 64, 128, 1024, 8

    key = jax.random.PRNGKey(0)
    k1, k2, k3, k4, k5 = jax.random.split(key, 5)
    head_emb = jax.random.normal(k1, (batch, emb_dim), dtype=jnp.float32)
    rel_emb = jax.random.normal(k2, (batch, emb_dim), dtype=jnp.float32)
    ent_embed = jax.random.normal(k3, (n_ent, emb_dim), dtype=jnp.float32)
    bias = jnp.zeros((n_ent,), dtype=jnp.float32)   # nn.Parameter(zeros(n_ent))

    # --- forward(): head_emb * rel_emb ------------------------------------
    pred = distmult_forward(head_emb, rel_emb)
    jax.block_until_ready(pred)
    ref_pred = head_emb * rel_emb
    assert jnp.allclose(pred, ref_pred, atol=1e-6), "forward mismatch"

    # --- get_logits(): pred @ ent_embed.T + bias (default tiles) ----------
    logits = distmult_get_logits(pred, ent_embed, bias)
    jax.block_until_ready(logits)
    ref_logits = ref_pred @ ent_embed.T + bias[None, :]
    assert jnp.allclose(logits, ref_logits, atol=1e-3, rtol=1e-3), \
        "get_logits mismatch"

    # --- fused path, small tiles to exercise the 2-D grid / index maps ----
    fused = distmult_forward_and_logits(head_emb, rel_emb, ent_embed, bias,
                                        tile_b=32, tile_n=256)
    jax.block_until_ready(fused)
    assert jnp.allclose(fused, ref_logits, atol=1e-3, rtol=1e-3), \
        "fused logits mismatch (f32)"

    # --- fused bf16 path (bf16 HBM operands, bf16 MXU, f32 acc/output) ----
    head_bf = head_emb.astype(jnp.bfloat16)
    rel_bf = rel_emb.astype(jnp.bfloat16)
    ent_bf = ent_embed.astype(jnp.bfloat16)
    fused_bf = distmult_forward_and_logits(head_bf, rel_bf, ent_bf, bias,
                                           out_dtype=jnp.float32,
                                           mxu_dtype=jnp.bfloat16)
    jax.block_until_ready(fused_bf)
    ref_bf = (jnp.dot((head_bf * rel_bf).astype(jnp.float32),
                      ent_bf.astype(jnp.float32).T)
              + bias[None, :])
    assert jnp.allclose(fused_bf, ref_bf, atol=5e-2, rtol=2e-2), \
        "fused logits mismatch (bf16)"

    # --- score_fn(): sum(pred[:,None,:] * sample_embed, -1) + bias --------
    sample_embed = jax.random.normal(k4, (batch, n_samp, emb_dim),
                                     dtype=jnp.float32)
    samp_bias = jax.random.normal(k5, (batch, n_samp), dtype=jnp.float32)
    scores = distmult_score_fn(pred, sample_embed, samp_bias)
    jax.block_until_ready(scores)
    ref_scores = jnp.sum(ref_pred[:, None, :] * sample_embed, axis=-1) + samp_bias
    assert jnp.allclose(scores, ref_scores, atol=1e-3, rtol=1e-3), \
        "score_fn mismatch"

    print("KERNEL_OK")
</pallas_src>

<mosaic_0001>
module attributes {stable_mosaic.version = 11 : i64} {
  func.func @_mul_kernel(%arg0: i32, %arg1: memref<64x128xf32, #tpu.memory_space<vmem>>, %arg2: memref<64x128xf32, #tpu.memory_space<vmem>>, %arg3: memref<64x128xf32, #tpu.memory_space<vmem>>) attributes {dimension_semantics = [#tpu.dimension_semantics<parallel>], iteration_bounds = array<i64: 1>, scalar_prefetch = 0 : i64, scratch_operands = 0 : i64, tpu.core_type = #tpu.core_type<tc>, window_params = [{transform_indices = @transform_0, window_bounds = array<i64: 64, 128>}, {transform_indices = @transform_1, window_bounds = array<i64: 64, 128>}, {transform_indices = @transform_2, window_bounds = array<i64: 64, 128>}]} {
    %c0 = arith.constant 0 : index
    %c0_0 = arith.constant 0 : index
    %0 = vector.load %arg1[%c0, %c0_0] : memref<64x128xf32, #tpu.memory_space<vmem>>, vector<64x128xf32>
    %c0_1 = arith.constant 0 : index
    %c0_2 = arith.constant 0 : index
    %1 = vector.load %arg2[%c0_1, %c0_2] : memref<64x128xf32, #tpu.memory_space<vmem>>, vector<64x128xf32>
    %2 = arith.mulf %0, %1 : vector<64x128xf32>
    %c0_3 = arith.constant 0 : index
    %c0_4 = arith.constant 0 : index
    %3 = vector.load %arg3[%c0_3, %c0_4] : memref<64x128xf32, #tpu.memory_space<vmem>>, vector<64x128xf32>
    tpu.vector_store %arg3[%c0_3, %c0_4], %2 {strides = array<i32>} : memref<64x128xf32, #tpu.memory_space<vmem>>, vector<64x128xf32>,
    return
  }
  func.func @transform_0(%arg0: i32) -> (i32, i32) {
    %c0_i32 = arith.constant 0 : i32
    %c0_i32_0 = arith.constant 0 : i32
    return %arg0, %c0_i32 : i32, i32
  }
  func.func @transform_1(%arg0: i32) -> (i32, i32) {
    %c0_i32 = arith.constant 0 : i32
    %c0_i32_0 = arith.constant 0 : i32
    return %arg0, %c0_i32 : i32, i32
  }
  func.func @transform_2(%arg0: i32) -> (i32, i32) {
    %c0_i32 = arith.constant 0 : i32
    %c0_i32_0 = arith.constant 0 : i32
    return %arg0, %c0_i32 : i32, i32
  }
}

</mosaic_0001>

<bundles_post_ra>
// kernel: tpu_custom_call.1
= control target key start
LH: loop header
LB: loop body
LE: loop exit
PB: predicated region body
PF: predicated region fallthrough
CT: control target
= control target key end

     0   :  { %7 = vsyncpa [#allocation3], 0  ;;  %s232_s0 = inlined_call_operand.hbm [shape: f32[64,128], index: 0, kind: input, shape index: {}]   ;;  %s233_s1 = inlined_call_operand.hbm [shape: f32[64,128], index: 1, kind: input, shape index: {}]   ;;  %s234_s2 = inlined_call_operand.hbm [shape: f32[64,128], index: 2, kind: output, shape index: {}]  }
   0x1   :  { %8 = vsyncpa [#allocation6], 0 }
   0x2   :  { %9 = vsyncpa [#allocation4], 0  ;;  %s167_s9 = smov [#allocation2]   ;;  %s95_s13 = scalar_lea.hbm %s232_s0, 1024 }
   0x3   :  { %s15_s10 = sshll.u32 %s167_s9, 4  ;;  %p96_p0 = scmp.ne.s32.totalorder %s232_s0, %s95_s13  ;;  %s16_s10 = int_to_ptr.vmem [resolvable:$true] %s15_s10 }
   0x4   :  { %p99_p1 = scmp.lt.u32.totalorder %s95_s13, %s232_s0 }
   0x6   :  { %p101_p2 = pnand %p99_p1, %p96_p0 }
   0x8   :  { %104 = shalt.err (!%p101_p2)
}
   0x9   :  { %s105_s18 = scalar_lea.vmem %s16_s10, 1024  ;;  %p110_p4 = scmp.lt.s32.totalorder %s16_s10, %s16_s10 }
   0xa   :  { %p106_p3 = scmp.ne.s32.totalorder %s16_s10, %s105_s18  ;;  %p111_p5 = scmp.lt.s32.totalorder %s105_s18, %s105_s18 }
   0xc   :  { %p112_p6 = por %p111_p5, %p110_p4 }
   0xe   :  { %p113_p7 = pnand %p112_p6, %p106_p3 }
  0x10   :  { %116 = shalt.err (!%p113_p7)
}
  0x11   :  { %s168_s19 = smov 128   ;;  %s169_s20 = smov 8  }
  0x12   :  { %21 = dma.hbm_to_vmem [thread:$0]  %s232_s0, 1024, %s16_s10, [#allocation3], %s168_s19, %s168_s19, %s169_s20  }
  0x13   :  { %s170_s23 = smov [#allocation5]   ;;  %s117_s27 = scalar_lea.hbm %s233_s1, 1024 }
  0x14   :  { %s27_s24 = sshll.u32 %s170_s23, 4  ;;  %p118_p8 = scmp.ne.s32.totalorder %s233_s1, %s117_s27  ;;  %s28_s24 = int_to_ptr.vmem [resolvable:$true] %s27_s24 }
  0x15   :  { %p121_p9 = scmp.lt.u32.totalorder %s117_s27, %s233_s1 }
  0x17   :  { %p123_p10 = pnand %p121_p9, %p118_p8 }
  0x19   :  { %126 = shalt.err (!%p123_p10)
}
  0x1a   :  { %s127_s4 = scalar_lea.vmem %s28_s24, 1024  ;;  %p132_p12 = scmp.lt.s32.totalorder %s28_s24, %s28_s24 }
  0x1b   :  { %p128_p11 = scmp.ne.s32.totalorder %s28_s24, %s127_s4  ;;  %p133_p13 = scmp.lt.s32.totalorder %s127_s4, %s127_s4 }
  0x1d   :  { %p134_p0 = por %p133_p13, %p132_p12 }
  0x1f   :  { %p135_p1 = pnand %p134_p0, %p128_p11 }
  0x21   :  { %138 = shalt.err (!%p135_p1)
}
  0x22   :  { %33 = dma.hbm_to_vmem [thread:$0]  %s233_s1, 1024, %s28_s24, [#allocation6], %s168_s19, %s168_s19, %s169_s20  }
  0x23   :  { %161 = dma.done.wait [#allocation3], 1024  }
  0x24   :  { %162 = vsyncadd [#allocation3], 4294966272 }
  0x25   :  { %163 = dma.done.wait [#allocation6], 1024  }
  0x26   :  { %164 = vsyncadd [#allocation6], 4294966272  ;;  %v40_v0 = vld [vmem:[#allocation2] sm:$0xff]  ;;  %v41_v2 = vld [vmem:[#allocation2 + $0x8] sm:$0xff]  ;;  %s171_s1 = smov [#allocation7]  }
  0x27   :  { %v48_v1 = vld [vmem:[#allocation5] sm:$0xff]  ;;  %v49_v4 = vld [vmem:[#allocation5 + $0x8] sm:$0xff]  ;;  %v42_v5 = vld [vmem:[#allocation2 + $0x10] sm:$0xff]  ;;  %s77_s6 = sshll.u32 %s171_s1, 4  ;;  %s78_s6 = int_to_ptr.vmem [resolvable:$true] %s77_s6 }
  0x28   :  { %v56_v3 = vmul.f32 %v48_v1, %v40_v0  ;;  %v50_v6 = vld [vmem:[#allocation5 + $0x10] sm:$0xff]  ;;  %v57_v7 = vmul.f32 %v49_v4, %v41_v2  ;;  %v43_v9 = vld [vmem:[#allocation2 + $0x18] sm:$0xff]  ;;  %v44_v11 = vld [vmem:[#allocation2 + $0x20] sm:$0xff]  ;;  %s139_s7 = scalar_lea.vmem %s78_s6, 1024  ;;  %p144_p3 = scmp.lt.s32.totalorder %s78_s6, %s78_s6 }
  0x29   :  { %v58_v8 = vmul.f32 %v50_v6, %v42_v5  ;;  %v51_v10 = vld [vmem:[#allocation5 + $0x18] sm:$0xff]  ;;  %v52_v13 = vld [vmem:[#allocation5 + $0x20] sm:$0xff]  ;;  %v45_v14 = vld [vmem:[#allocation2 + $0x28] sm:$0xff]  ;;  %p140_p2 = scmp.ne.s32.totalorder %s78_s6, %s139_s7  ;;  %p145_p4 = scmp.lt.s32.totalorder %s139_s7, %s139_s7 }
  0x2a   :  { %64 = vst [vmem:[#allocation7] sm:$0xff] %v56_v3  ;;  %v59_v12 = vmul.f32 %v51_v10, %v43_v9  ;;  %v53_v15 = vld [vmem:[#allocation5 + $0x28] sm:$0xff]  ;;  %65 = vst [vmem:[#allocation7 + $0x8] sm:$0xff] %v57_v7  ;;  %v60_v16 = vmul.f32 %v52_v13, %v44_v11  ;;  %v46_v18 = vld [vmem:[#allocation2 + $0x30] sm:$0xff] }
  0x2b   :  { %66 = vst [vmem:[#allocation7 + $0x10] sm:$0xff] %v58_v8  ;;  %v61_v17 = vmul.f32 %v53_v15, %v45_v14  ;;  %v54_v19 = vld [vmem:[#allocation5 + $0x30] sm:$0xff]  ;;  %v47_v20 = vld [vmem:[#allocation2 + $0x38] sm:$0xff]  ;;  %p146_p5 = por %p145_p4, %p144_p3 }
  0x2c   :  { %67 = vst [vmem:[#allocation7 + $0x18] sm:$0xff] %v59_v12  ;;  %v62_v21 = vmul.f32 %v54_v19, %v46_v18  ;;  %v55_v22 = vld [vmem:[#allocation5 + $0x38] sm:$0xff]  ;;  %68 = vst [vmem:[#allocation7 + $0x20] sm:$0xff] %v60_v16 }
  0x2d   :  { %69 = vst [vmem:[#allocation7 + $0x28] sm:$0xff] %v61_v17  ;;  %v63_v23 = vmul.f32 %v55_v22, %v47_v20  ;;  %p147_p6 = pnand %p146_p5, %p140_p2 }
  0x2e   :  { %70 = vst [vmem:[#allocation7 + $0x30] sm:$0xff] %v62_v21 }
  0x2f   :  { %71 = vst [vmem:[#allocation7 + $0x38] sm:$0xff] %v63_v23 }
  0x30   :  { %150 = shalt.err (!%p147_p6)
}
  0x31   :  { %s151_s10 = scalar_lea.hbm %s234_s2, 1024 }
  0x32   :  { %p152_p7 = scmp.ne.s32.totalorder %s234_s2, %s151_s10  ;;  %p155_p8 = scmp.lt.u32.totalorder %s151_s10, %s234_s2 }
  0x34   :  { %p157_p9 = pnand %p155_p8, %p152_p7 }
  0x36   :  { %160 = shalt.err (!%p157_p9)
}
  0x37   :  { %83 = dma.vmem_to_hbm [thread:$0]  %s78_s6, 1024, %s234_s2, [#allocation4], %s168_s19, %s168_s19, %s169_s20  }
  0x38   :  { %165 = dma.done.wait [#allocation4], 1024  }
  0x39   :  { %166 = vsyncadd [#allocation4], 4294966272 }
  0x3a   :  { %87 = vsyncpa [#allocation3], 1 }
  0x3b   :  { %88 = vsyncpa [#allocation6], 1 }
  0x3c   :  { %89 = vsyncpa [#allocation4], 1 }

</bundles_post_ra>
